<compile_context>
chip_gen: v6e
topology: v6e:2x2x1
jax: 0.10.0
libtpu: 0.0.40
codegen_flags: <defaults>
</compile_context>

<pallas_src>
import functools

import jax
import jax.numpy as jnp
from jax.experimental import pallas as pl
from jax.experimental.pallas import tpu as pltpu

LEAKY_SLOPE = 0.01   # nn.LeakyReLU() default
BN_EPS = 1e-5        # nn.BatchNorm2d default


def _round_up(a, b):
    return ((a + b - 1) // b) * b


def _stats_kernel(x_ref, w_ref, stats_ref, *, nb):
    """Pass 1: LeakyReLU + fused block-diagonal 1x1 conv, per-tile BN partials.

    x_ref     : (nb, 2*C_in, sp)   channel-major tile (spatial on lanes)
    w_ref     : (C_out, 2*C_in)    resident fused weight
    stats_ref : (1, C_out, 2)      per-grid-step [sum | sum-of-squares]
    """
    c_out = w_ref.shape[0]
    x = x_ref[...].astype(jnp.float32)
    x = jnp.where(x >= 0, x, LEAKY_SLOPE * x)

    ssum = jnp.zeros((c_out, 1), jnp.float32)
    ssq = jnp.zeros((c_out, 1), jnp.float32)
    for b in range(nb):                                   # static, unrolled
        y = jnp.dot(w_ref[...], x[b].astype(w_ref.dtype),
                    preferred_element_type=jnp.float32)   # (C_out, sp)
        ssum = ssum + jnp.sum(y, axis=1, keepdims=True)
        ssq = ssq + jnp.sum(y * y, axis=1, keepdims=True)

    stats_ref[0, :, 0:1] = ssum
    stats_ref[0, :, 1:2] = ssq


def _apply_kernel(x_ref, w_ref, b_ref, o_ref, *, nb):
    """Pass 2: out = (scale*W) @ LeakyReLU(x) + bias, lane-dense (C_out, sp) stores.

    x_ref : (nb, 2*C_in, sp)   same tiles as pass 1 (recompute -> no y round trip)
    w_ref : (C_out, 2*C_in)    BN-scale-folded fused weight (resident)
    b_ref : (C_out, 1)         BN bias column (resident, f32)
    o_ref : (nb, C_out, sp)    NCHW-ordered output tile
    """
    x = x_ref[...].astype(jnp.float32)
    x = jnp.where(x >= 0, x, LEAKY_SLOPE * x)
    bias = b_ref[...]                                      # (C_out, 1) f32
    for b in range(nb):                                    # static, unrolled
        y = jnp.dot(w_ref[...], x[b].astype(w_ref.dtype),
                    preferred_element_type=jnp.float32)    # (C_out, sp)
        o_ref[b] = (y + bias).astype(o_ref.dtype)


@functools.partial(jax.jit, static_argnames=("tile_lanes", "compute_dtype"))
def factorized_reduce(x_nchw, w1, w2, gamma, beta, *,
                      tile_lanes=512, compute_dtype=None):
    """x_nchw: (N, C_in, H, W), H and W even.  Returns (N, 2*C_half, H//2, W//2)."""
    N, C_in, H, W = x_nchw.shape
    assert H % 2 == 0 and W % 2 == 0, "FactorizedReduce needs even H, W"
    C_half = w1.shape[0]
    C_out = 2 * C_half
    Ho, Wo = H // 2, W // 2
    SP = Ho * Wo
    f32 = jnp.float32
    out_dtype = x_nchw.dtype
    cdt = jnp.dtype(compute_dtype) if compute_dtype is not None else jnp.dtype(out_dtype)

    # ---- tiling: spatial axis on lanes (multiple of 128); group small images
    # into one grid step so per-step work stays above the ~0.35us grid overhead.
    tile_lanes = max(128, _round_up(int(tile_lanes), 128))
    sp_block = min(tile_lanes, _round_up(SP, 128))
    SP_pad = _round_up(SP, sp_block)
    S = SP_pad // sp_block                      # spatial tiles per image
    nb = 1 if S > 1 else max(1, min(N, tile_lanes // sp_block))
    N_pad = _round_up(N, nb)
    NB = N_pad // nb                            # batch-group tiles
    G = NB * S                                  # grid steps per pass

    # ---- channel-major stride-2 gather: (N_pad, 2*C_in, SP_pad).  No NCHW<->NHWC
    # transpose on either side; padded rows/cols are zero -> LeakyReLU -> 0 ->
    # contribute nothing to the BN sums (true count is used as divisor).
    # TODO(synk): fuse this strided gather + pad into the kernels via manual DMA.
    xv = x_nchw.reshape(N, C_in, Ho, 2, Wo, 2)
    x1 = xv[:, :, :, 0, :, 0]                                     # offset (0, 0)
    x2 = xv[:, :, :, 1, :, 1]                                     # offset (1, 1)
    xcat = jnp.concatenate([x1, x2], axis=1).reshape(N, 2 * C_in, SP)
    xcat = jnp.pad(xcat, ((0, N_pad - N), (0, 0), (0, SP_pad - SP)))
    xcat = xcat.astype(cdt)

    # ---- fused block-diagonal weight, (C_out, 2*C_in):  y = Wt @ [x1; x2].
    w1m = w1.reshape(C_half, C_in).astype(f32)
    w2m = w2.reshape(C_half, C_in).astype(f32)
    w_bd = jnp.zeros((C_out, 2 * C_in), f32)
    w_bd = w_bd.at[:C_half, :C_in].set(w1m)
    w_bd = w_bd.at[C_half:, C_in:].set(w2m)

    x_bytes = jnp.dtype(cdt).itemsize
    o_bytes = jnp.dtype(out_dtype).itemsize
    step_bytes = nb * sp_block * (2 * C_in * x_bytes + C_out * max(o_bytes, 4))
    vmem_limit = int(min(48 * 1024 * 1024,                 # v7x has only 64 MiB VMEM
                         max(32 * 1024 * 1024, 6 * step_bytes)))

    # ---- pass 1: BN batch statistics (per-tile partials, fully parallel grid) --
    stats = pl.pallas_call(
        functools.partial(_stats_kernel, nb=nb),
        out_shape=jax.ShapeDtypeStruct((G, C_out, 2), f32),
        grid=(NB, S),
        in_specs=[
            pl.BlockSpec((nb, 2 * C_in, sp_block), lambda b, s: (b, 0, s)),
            pl.BlockSpec((C_out, 2 * C_in), lambda b, s: (0, 0)),      # resident
        ],
        out_specs=pl.BlockSpec((1, C_out, 2), lambda b, s: (b * S + s, 0, 0)),
        compiler_params=pltpu.CompilerParams(
            dimension_semantics=("parallel", "parallel"),
            vmem_limit_bytes=vmem_limit),
    )(xcat, w_bd.astype(cdt))

    # ---- fold BN into the conv weights (tiny per-channel math, stays in jit) ---
    cnt = jnp.float32(N * SP)                           # true element count
    s1 = jnp.sum(stats[:, :, 0], axis=0)                # (C_out,)
    s2 = jnp.sum(stats[:, :, 1], axis=0)
    mean = s1 / cnt
    # NOTE: E[y^2]-E[y]^2 in f32 can cancel for very large counts / biased means;
    # clamp at 0.  (Exact sum((y-mean)^2) would need a third pass.)
    var = jnp.maximum(s2 / cnt - mean * mean, 0.0)      # biased variance (PyTorch BN)
    scale = gamma.astype(f32) * jax.lax.rsqrt(var + BN_EPS)        # (C_out,)
    bias = (beta.astype(f32) - mean * scale).reshape(C_out, 1)     # (C_out, 1), f32
    w_scaled = (w_bd * scale[:, None]).astype(cdt)                 # fold scale into W

    # ---- pass 2: out = W_scaled @ LeakyReLU(x) + bias, NCHW emitted directly ---
    out = pl.pallas_call(
        functools.partial(_apply_kernel, nb=nb),
        out_shape=jax.ShapeDtypeStruct((N_pad, C_out, SP_pad), out_dtype),
        grid=(NB, S),
        in_specs=[
            pl.BlockSpec((nb, 2 * C_in, sp_block), lambda b, s: (b, 0, s)),
            pl.BlockSpec((C_out, 2 * C_in), lambda b, s: (0, 0)),      # resident
            pl.BlockSpec((C_out, 1), lambda b, s: (0, 0)),             # resident
        ],
        out_specs=pl.BlockSpec((nb, C_out, sp_block), lambda b, s: (b, 0, s)),
        compiler_params=pltpu.CompilerParams(
            dimension_semantics=("parallel", "parallel"),
            vmem_limit_bytes=vmem_limit),
    )(xcat, w_scaled, bias)

    return out[:N, :, :SP].reshape(N, C_out, Ho, Wo)


if __name__ == "__main__":
    key = jax.random.PRNGKey(0)
    k_x, k_w1, k_w2 = jax.random.split(key, 3)

    # Single_Path_Op with stride=2 -> 'skip_connect' -> FactorizedReduce(C, C, affine=False)
    N, C, H, W = 2, 8, 16, 16
    C_half = C // 2

    x = jax.random.normal(k_x, (N, C, H, W), dtype=jnp.float32)
    # Conv2d(C, C//2, 1, stride=2, bias=False) weights: (C_half, C, 1, 1)
    w1 = 0.1 * jax.random.normal(k_w1, (C_half, C, 1, 1), dtype=jnp.float32)
    w2 = 0.1 * jax.random.normal(k_w2, (C_half, C, 1, 1), dtype=jnp.float32)
    # affine=False BatchNorm forward math == gamma=1, beta=0
    gamma = jnp.ones((C,), jnp.float32)
    beta = jnp.zeros((C,), jnp.float32)

    out = factorized_reduce(x, w1, w2, gamma, beta)
    out = jax.block_until_ready(out)
    assert out.shape == (N, C, H // 2, W // 2), out.shape

    # Pure-JAX reference (PyTorch training-mode BN: biased variance).
    xa = jnp.where(x >= 0, x, LEAKY_SLOPE * x)
    y1 = jnp.einsum('nchw,oc->nohw', xa[:, :, 0::2, 0::2], w1.reshape(C_half, C))
    y2 = jnp.einsum('nchw,oc->nohw', xa[:, :, 1::2, 1::2], w2.reshape(C_half, C))
    yr = jnp.concatenate([y1, y2], axis=1)
    mu = jnp.mean(yr, axis=(0, 2, 3), keepdims=True)
    va = jnp.mean((yr - mu) ** 2, axis=(0, 2, 3), keepdims=True)
    ref = (yr - mu) * jax.lax.rsqrt(va + BN_EPS)
    ref = ref * gamma.reshape(1, C, 1, 1) + beta.reshape(1, C, 1, 1)

    err = float(jnp.max(jnp.abs(out - ref)))
    assert err < 1e-2, f"max abs err {err}"
    print("KERNEL_OK")
</pallas_src>

<mosaic_0001>
module attributes {stable_mosaic.version = 11 : i64} {
  func.func @_stats_kernel(%arg0: i32, %arg1: i32, %arg2: memref<2x16x128xf32, #tpu.memory_space<vmem>>, %arg3: memref<8x16xf32, #tpu.memory_space<vmem>>, %arg4: memref<1x8x2xf32, #tpu.memory_space<vmem>>) attributes {dimension_semantics = [#tpu.dimension_semantics<parallel>, #tpu.dimension_semantics<parallel>], iteration_bounds = array<i64: 1, 1>, scalar_prefetch = 0 : i64, scratch_operands = 0 : i64, tpu.core_type = #tpu.core_type<tc>, window_params = [{transform_indices = @transform_0, window_bounds = array<i64: 2, 16, 128>}, {pipeline_mode = #tpu.pipeline_mode<synchronous>, transform_indices = @transform_1, window_bounds = array<i64: 8, 16>}, {transform_indices = @transform_2, window_bounds = array<i64: 1, 8, 2>}]} {
    %c0 = arith.constant 0 : index
    %c0_0 = arith.constant 0 : index
    %c0_1 = arith.constant 0 : index
    %0 = vector.load %arg2[%c0, %c0_0, %c0_1] : memref<2x16x128xf32, #tpu.memory_space<vmem>>, vector<2x16x128xf32>
    %cst = arith.constant 0.000000e+00 : f32
    %1 = vector.broadcast %cst : f32 to vector<2x16x128xf32>
    %2 = arith.cmpf oge, %0, %1 : vector<2x16x128xf32>
    %cst_2 = arith.constant 0.00999999977 : f32
    %3 = vector.broadcast %cst_2 : f32 to vector<2x16x128xf32>
    %4 = arith.mulf %3, %0 : vector<2x16x128xf32>
    %5 = arith.select %2, %0, %4 : vector<2x16x128xi1>, vector<2x16x128xf32>
    %cst_3 = arith.constant 0.000000e+00 : f32
    %6 = vector.broadcast %cst_3 : f32 to vector<8x1xf32>
    %cst_4 = arith.constant 0.000000e+00 : f32
    %7 = vector.broadcast %cst_4 : f32 to vector<8x1xf32>
    %c0_5 = arith.constant 0 : index
    %c0_6 = arith.constant 0 : index
    %8 = vector.load %arg3[%c0_5, %c0_6] : memref<8x16xf32, #tpu.memory_space<vmem>>, vector<8x16xf32>
    %9 = vector.extract_strided_slice %5 {offsets = [0, 0, 0], sizes = [1, 16, 128], strides = [1, 1, 1]} : vector<2x16x128xf32> to vector<1x16x128xf32>
    %10 = vector.shape_cast %9 : vector<1x16x128xf32> to vector<16x128xf32>
    %cst_7 = arith.constant dense<0.000000e+00> : vector<8x128xf32>
    %11 = tpu.matmul %8, %10, %cst_7 {dimension_numbers = #tpu.dot_dimension_numbers<[1], [0], [0], [1], [0, 0, 1, 1], [], []>} : vector<8x16xf32>, vector<16x128xf32>, vector<8x128xf32> -> vector<8x128xf32>
    %cst_8 = arith.constant dense<0.000000e+00> : vector<8xf32>
    %12 = vector.multi_reduction <add>, %11, %cst_8 [1] : vector<8x128xf32> to vector<8xf32>
    %13 = vector.shape_cast %12 : vector<8xf32> to vector<8x1xf32>
    %14 = arith.addf %6, %13 : vector<8x1xf32>
    %15 = arith.mulf %11, %11 : vector<8x128xf32>
    %cst_9 = arith.constant dense<0.000000e+00> : vector<8xf32>
    %16 = vector.multi_reduction <add>, %15, %cst_9 [1] : vector<8x128xf32> to vector<8xf32>
    %17 = vector.shape_cast %16 : vector<8xf32> to vector<8x1xf32>
    %18 = arith.addf %7, %17 : vector<8x1xf32>
    %c0_10 = arith.constant 0 : index
    %c0_11 = arith.constant 0 : index
    %19 = vector.load %arg3[%c0_10, %c0_11] : memref<8x16xf32, #tpu.memory_space<vmem>>, vector<8x16xf32>
    %20 = vector.extract_strided_slice %5 {offsets = [1, 0, 0], sizes = [1, 16, 128], strides = [1, 1, 1]} : vector<2x16x128xf32> to vector<1x16x128xf32>
    %21 = vector.shape_cast %20 : vector<1x16x128xf32> to vector<16x128xf32>
    %cst_12 = arith.constant dense<0.000000e+00> : vector<8x128xf32>
    %22 = tpu.matmul %19, %21, %cst_12 {dimension_numbers = #tpu.dot_dimension_numbers<[1], [0], [0], [1], [0, 0, 1, 1], [], []>} : vector<8x16xf32>, vector<16x128xf32>, vector<8x128xf32> -> vector<8x128xf32>
    %cst_13 = arith.constant dense<0.000000e+00> : vector<8xf32>
    %23 = vector.multi_reduction <add>, %22, %cst_13 [1] : vector<8x128xf32> to vector<8xf32>
    %24 = vector.shape_cast %23 : vector<8xf32> to vector<8x1xf32>
    %25 = arith.addf %14, %24 : vector<8x1xf32>
    %26 = arith.mulf %22, %22 : vector<8x128xf32>
    %cst_14 = arith.constant dense<0.000000e+00> : vector<8xf32>
    %27 = vector.multi_reduction <add>, %26, %cst_14 [1] : vector<8x128xf32> to vector<8xf32>
    %28 = vector.shape_cast %27 : vector<8xf32> to vector<8x1xf32>
    %29 = arith.addf %18, %28 : vector<8x1xf32>
    %c0_15 = arith.constant 0 : index
    %c0_16 = arith.constant 0 : index
    %c0_17 = arith.constant 0 : index
    %30 = vector.load %arg4[%c0_15, %c0_16, %c0_17] : memref<1x8x2xf32, #tpu.memory_space<vmem>>, vector<1x8x1xf32>
    %31 = vector.shape_cast %30 : vector<1x8x1xf32> to vector<8x1xf32>
    %32 = vector.shape_cast %25 : vector<8x1xf32> to vector<1x8x1xf32>
    tpu.vector_store %arg4[%c0_15, %c0_16, %c0_17], %32 {strides = array<i32>} : memref<1x8x2xf32, #tpu.memory_space<vmem>>, vector<1x8x1xf32>,
    %c0_18 = arith.constant 0 : index
    %c0_19 = arith.constant 0 : index
    %c1 = arith.constant 1 : index
    %33 = vector.load %arg4[%c0_18, %c0_19, %c1] : memref<1x8x2xf32, #tpu.memory_space<vmem>>, vector<1x8x1xf32>
    %34 = vector.shape_cast %33 : vector<1x8x1xf32> to vector<8x1xf32>
    %35 = vector.shape_cast %29 : vector<8x1xf32> to vector<1x8x1xf32>
    tpu.vector_store %arg4[%c0_18, %c0_19, %c1], %35 {strides = array<i32>} : memref<1x8x2xf32, #tpu.memory_space<vmem>>, vector<1x8x1xf32>,
    return
  }
  func.func @transform_0(%arg0: i32, %arg1: i32) -> (i32, i32, i32) {
    %c0_i32 = arith.constant 0 : i32
    %c0_i32_0 = arith.constant 0 : i32
    return %arg0, %c0_i32, %arg1 : i32, i32, i32
  }
  func.func @transform_1(%arg0: i32, %arg1: i32) -> (i32, i32) {
    %c0_i32 = arith.constant 0 : i32
    %c0_i32_0 = arith.constant 0 : i32
    %c0_i32_1 = arith.constant 0 : i32
    return %c0_i32, %c0_i32_0 : i32, i32
  }
  func.func @transform_2(%arg0: i32, %arg1: i32) -> (i32, i32, i32) {
    %c1_i32 = arith.constant 1 : i32
    %0 = arith.muli %arg0, %c1_i32 : i32
    %1 = arith.addi %0, %arg1 : i32
    %c0_i32 = arith.constant 0 : i32
    %c0_i32_0 = arith.constant 0 : i32
    %c0_i32_1 = arith.constant 0 : i32
    return %1, %c0_i32, %c0_i32_0 : i32, i32, i32
  }
}

module attributes {stable_mosaic.version = 11 : i64} {
  func.func @_apply_kernel(%arg0: i32, %arg1: i32, %arg2: memref<2x16x128xf32, #tpu.memory_space<vmem>>, %arg3: memref<8x16xf32, #tpu.memory_space<vmem>>, %arg4: memref<8x1xf32, #tpu.memory_space<vmem>>, %arg5: memref<2x8x128xf32, #tpu.memory_space<vmem>>) attributes {dimension_semantics = [#tpu.dimension_semantics<parallel>, #tpu.dimension_semantics<parallel>], iteration_bounds = array<i64: 1, 1>, scalar_prefetch = 0 : i64, scratch_operands = 0 : i64, tpu.core_type = #tpu.core_type<tc>, window_params = [{transform_indices = @transform_0, window_bounds = array<i64: 2, 16, 128>}, {pipeline_mode = #tpu.pipeline_mode<synchronous>, transform_indices = @transform_1, window_bounds = array<i64: 8, 16>}, {pipeline_mode = #tpu.pipeline_mode<synchronous>, transform_indices = @transform_2, window_bounds = array<i64: 8, 1>}, {transform_indices = @transform_3, window_bounds = array<i64: 2, 8, 128>}]} {
    %c0 = arith.constant 0 : index
    %c0_0 = arith.constant 0 : index
    %c0_1 = arith.constant 0 : index
    %0 = vector.load %arg2[%c0, %c0_0, %c0_1] : memref<2x16x128xf32, #tpu.memory_space<vmem>>, vector<2x16x128xf32>
    %cst = arith.constant 0.000000e+00 : f32
    %1 = vector.broadcast %cst : f32 to vector<2x16x128xf32>
    %2 = arith.cmpf oge, %0, %1 : vector<2x16x128xf32>
    %cst_2 = arith.constant 0.00999999977 : f32
    %3 = vector.broadcast %cst_2 : f32 to vector<2x16x128xf32>
    %4 = arith.mulf %3, %0 : vector<2x16x128xf32>
    %5 = arith.select %2, %0, %4 : vector<2x16x128xi1>, vector<2x16x128xf32>
    %c0_3 = arith.constant 0 : index
    %c0_4 = arith.constant 0 : index
    %6 = vector.load %arg4[%c0_3, %c0_4] : memref<8x1xf32, #tpu.memory_space<vmem>>, vector<8x1xf32>
    %c0_5 = arith.constant 0 : index
    %c0_6 = arith.constant 0 : index
    %7 = vector.load %arg3[%c0_5, %c0_6] : memref<8x16xf32, #tpu.memory_space<vmem>>, vector<8x16xf32>
    %8 = vector.extract_strided_slice %5 {offsets = [0, 0, 0], sizes = [1, 16, 128], strides = [1, 1, 1]} : vector<2x16x128xf32> to vector<1x16x128xf32>
    %9 = vector.shape_cast %8 : vector<1x16x128xf32> to vector<16x128xf32>
    %cst_7 = arith.constant dense<0.000000e+00> : vector<8x128xf32>
    %10 = tpu.matmul %7, %9, %cst_7 {dimension_numbers = #tpu.dot_dimension_numbers<[1], [0], [0], [1], [0, 0, 1, 1], [], []>} : vector<8x16xf32>, vector<16x128xf32>, vector<8x128xf32> -> vector<8x128xf32>
    %11 = vector.broadcast %6 : vector<8x1xf32> to vector<8x128xf32>
    %12 = arith.addf %10, %11 : vector<8x128xf32>
    %c0_8 = arith.constant 0 : index
    %c0_9 = arith.constant 0 : index
    %c0_10 = arith.constant 0 : index
    %13 = vector.load %arg5[%c0_8, %c0_9, %c0_10] : memref<2x8x128xf32, #tpu.memory_space<vmem>>, vector<1x8x128xf32>
    %14 = vector.shape_cast %13 : vector<1x8x128xf32> to vector<8x128xf32>
    %15 = vector.shape_cast %12 : vector<8x128xf32> to vector<1x8x128xf32>
    tpu.vector_store %arg5[%c0_8, %c0_9, %c0_10], %15 {strides = array<i32>} : memref<2x8x128xf32, #tpu.memory_space<vmem>>, vector<1x8x128xf32>,
    %c0_11 = arith.constant 0 : index
    %c0_12 = arith.constant 0 : index
    %16 = vector.load %arg3[%c0_11, %c0_12] : memref<8x16xf32, #tpu.memory_space<vmem>>, vector<8x16xf32>
    %17 = vector.extract_strided_slice %5 {offsets = [1, 0, 0], sizes = [1, 16, 128], strides = [1, 1, 1]} : vector<2x16x128xf32> to vector<1x16x128xf32>
    %18 = vector.shape_cast %17 : vector<1x16x128xf32> to vector<16x128xf32>
    %cst_13 = arith.constant dense<0.000000e+00> : vector<8x128xf32>
    %19 = tpu.matmul %16, %18, %cst_13 {dimension_numbers = #tpu.dot_dimension_numbers<[1], [0], [0], [1], [0, 0, 1, 1], [], []>} : vector<8x16xf32>, vector<16x128xf32>, vector<8x128xf32> -> vector<8x128xf32>
    %20 = vector.broadcast %6 : vector<8x1xf32> to vector<8x128xf32>
    %21 = arith.addf %19, %20 : vector<8x128xf32>
    %c1 = arith.constant 1 : index
    %c0_14 = arith.constant 0 : index
    %c0_15 = arith.constant 0 : index
    %22 = vector.load %arg5[%c1, %c0_14, %c0_15] : memref<2x8x128xf32, #tpu.memory_space<vmem>>, vector<1x8x128xf32>
    %23 = vector.shape_cast %22 : vector<1x8x128xf32> to vector<8x128xf32>
    %24 = vector.shape_cast %21 : vector<8x128xf32> to vector<1x8x128xf32>
    tpu.vector_store %arg5[%c1, %c0_14, %c0_15], %24 {strides = array<i32>} : memref<2x8x128xf32, #tpu.memory_space<vmem>>, vector<1x8x128xf32>,
    return
  }
  func.func @transform_0(%arg0: i32, %arg1: i32) -> (i32, i32, i32) {
    %c0_i32 = arith.constant 0 : i32
    %c0_i32_0 = arith.constant 0 : i32
    return %arg0, %c0_i32, %arg1 : i32, i32, i32
  }
  func.func @transform_1(%arg0: i32, %arg1: i32) -> (i32, i32) {
    %c0_i32 = arith.constant 0 : i32
    %c0_i32_0 = arith.constant 0 : i32
    %c0_i32_1 = arith.constant 0 : i32
    return %c0_i32, %c0_i32_0 : i32, i32
  }
  func.func @transform_2(%arg0: i32, %arg1: i32) -> (i32, i32) {
    %c0_i32 = arith.constant 0 : i32
    %c0_i32_0 = arith.constant 0 : i32
    %c0_i32_1 = arith.constant 0 : i32
    return %c0_i32, %c0_i32_0 : i32, i32
  }
  func.func @transform_3(%arg0: i32, %arg1: i32) -> (i32, i32, i32) {
    %c0_i32 = arith.constant 0 : i32
    %c0_i32_0 = arith.constant 0 : i32
    return %arg0, %c0_i32, %arg1 : i32, i32, i32
  }
}

</mosaic_0001>

<bundles_post_ra>
// kernel: factorized_reduce.3
= control target key start
LH: loop header
LB: loop body
LE: loop exit
PB: predicated region body
PF: predicated region fallthrough
CT: control target
= control target key end

     0   :  { %v219_v0 = vmov 0.0   ;;  %vm220_vm2 = vmmov 0   ;;  %v221_v8 = vmov 0   ;;  %vm37_vm5 = vcmask 130048   ;;  %s266_s0 = inlined_call_operand.vmem [shape: f32[2,16,128], index: 0, kind: input, shape index: {}]   ;;  %s267_s2 = inlined_call_operand.vmem [shape: f32[8,1], index: 2, kind: input, shape index: {}]   ;;  %s268_s1 = inlined_call_operand.vmem [shape: f32[8,16], index: 1, kind: input, shape index: {}]   ;;  %s269_s3 = inlined_call_operand.vmem [shape: f32[2,8,128], index: 3, kind: output, shape index: {}]  }
   0x1   :  { %201 = vmatprep.subr.mxu0 %v219_v0  ;;  %208 = vmatprep.subr.mxu1 %v219_v0  ;;  %v15_v1 = vld [vmem:[%s266_s0 + $0x8] sm:$0xff]  ;;  %v17_v2 = vld [vmem:[%s266_s0 + $0x18] sm:$0xff]  ;;  %v14_v3 = vld [vmem:[%s266_s0] sm:$0xff] }
   0x2   :  { %vm19_vm0 = vcmp.ge.f32.partialorder %v15_v1, 0.0  ;;  %v23_v4 = vmul.f32 0.01, %v15_v1  ;;  %vm21_vm1 = vcmp.ge.f32.partialorder %v17_v2, 0.0  ;;  %v25_v5 = vmul.f32 0.01, %v17_v2  ;;  %205 = vmatprep.mubr.msk.f32.mxu0 %vm220_vm2, %v219_v0  ;;  %212 = vmatprep.mubr.msk.f32.mxu1 %vm220_vm2, %v219_v0 }
   0x3   :  { %vm18_vm3 = vcmp.ge.f32.partialorder %v14_v3, 0.0  ;;  %v22_v6 = vmul.f32 0.01, %v14_v3  ;;  %v16_v7 = vld [vmem:[%s266_s0 + $0x10] sm:$0xff]  ;;  %218 = vset.pattern.permute.xlu0 %v221_v8  ;;  %v30_v9 = vld [vmem:[%s267_s2] sm:$0xff] }
   0x4   :  { %v27_v10 = vsel %vm19_vm0, %v15_v1, %v23_v4  ;;  %v29_v11 = vsel %vm21_vm1, %v17_v2, %v25_v5  ;;  %vm20_vm4 = vcmp.ge.f32.partialorder %v16_v7, 0.0  ;;  %v24_v12 = vmul.f32 0.01, %v16_v7  ;;  %34 = vperm.xlu0 %218, %v30_v9   ;;  %v31_v14 = vld [vmem:[%s268_s1] sm:$0xff] }
   0x5   :  { %202 = vmatpush3.msra.mxu0 %v27_v10  ;;  %209 = vmatpush3.msra.mxu1 %v29_v11  ;;  %v26_v13 = vsel %vm18_vm3, %v14_v3, %v22_v6 }
   0x6   :  { %203 = vmatprep.subr.mxu0 %v219_v0  ;;  %210 = vmatprep.subr.mxu1 %v219_v0  ;;  %v28_v15 = vsel %vm20_vm4, %v16_v7, %v24_v12 }
   0x7   :  { %204 = vmatpush3.msra.mxu0 %v26_v13  ;;  %211 = vmatpush3.msra.mxu1 %v28_v15 }
   0x8   :  { %206 = vmatmul.mubr.msk.f32.vlgmr.msra.gmra.mxu0 %vm37_vm5, %v31_v14  ;;  %213 = vmatmul.mubr.msk.f32.vlgmr.msra.gmra.mxu1 %vm37_vm5, %v31_v14 }
  0x7f   :  { %v35_v16 = vpop.permute.xlu0 %34 }
  0xc8   :  { %v107_v17 = vpop.f32.mrf.mxu0  ;;  %v182_v18 = vpop.f32.mrf.mxu1 }
  0xc9   :  { %v108_v19 = vadd.f32 %v107_v17, %v35_v16  ;;  %v183_v20 = vadd.f32 %v182_v18, %v35_v16 }
  0xca   :  { %v207_v21 = vpop.f32.mrf.mxu0  ;;  %v214_v22 = vpop.f32.mrf.mxu1 }
  0xcb   :  { %111 = vst [vmem:[%s269_s3] sm:$0xff] %v108_v19  ;;  %194 = vst [vmem:[%s269_s3 + $0x8] sm:$0xff] %v183_v20 }

// kernel: factorized_reduce.2
= control target key start
LH: loop header
LB: loop body
LE: loop exit
PB: predicated region body
PF: predicated region fallthrough
CT: control target
= control target key end

     0   :  { %v248_v0 = vmov 0.0   ;;  %vm249_vm2 = vmmov 0   ;;  %vm39_vm5 = vcmask 130048   ;;  %vm197_vm6 = vcmask 7168   ;;  %s286_s0 = inlined_call_operand.vmem [shape: f32[2,16,128], index: 0, kind: input, shape index: {}]   ;;  %s287_s1 = inlined_call_operand.vmem [shape: f32[8,16], index: 1, kind: input, shape index: {}]   ;;  %s288_s2 = inlined_call_operand.vmem [shape: f32[1,8,2], index: 2, kind: output, shape index: {}]  }
   0x1   :  { %232 = vmatprep.subr.mxu0 %v248_v0  ;;  %v23_v1 = vld [vmem:[%s286_s0 + $0x8] sm:$0xff]  ;;  %239 = vmatprep.subr.mxu1 %v248_v0  ;;  %v22_v2 = vld [vmem:[%s286_s0] sm:$0xff]  ;;  %v25_v3 = vld [vmem:[%s286_s0 + $0x18] sm:$0xff]  ;;  %vm199_vm7 = vcmask 15368  }
   0x2   :  { %vm27_vm0 = vcmp.ge.f32.partialorder %v23_v1, 0.0  ;;  %v31_v4 = vmul.f32 0.01, %v23_v1  ;;  %vm26_vm1 = vcmp.ge.f32.partialorder %v22_v2, 0.0  ;;  %v30_v5 = vmul.f32 0.01, %v22_v2  ;;  %236 = vmatprep.mubr.msk.f32.mxu0 %vm249_vm2, %v248_v0  ;;  %243 = vmatprep.mubr.msk.f32.mxu1 %vm249_vm2, %v248_v0 }
   0x3   :  { %vm29_vm3 = vcmp.ge.f32.partialorder %v25_v3, 0.0  ;;  %v33_v6 = vmul.f32 0.01, %v25_v3  ;;  %v24_v7 = vld [vmem:[%s286_s0 + $0x10] sm:$0xff]  ;;  %v38_v12 = vld [vmem:[%s287_s1] sm:$0xff] }
   0x4   :  { %v35_v8 = vsel %vm27_vm0, %v23_v1, %v31_v4  ;;  %v34_v9 = vsel %vm26_vm1, %v22_v2, %v30_v5  ;;  %vm28_vm4 = vcmp.ge.f32.partialorder %v24_v7, 0.0  ;;  %v32_v10 = vmul.f32 0.01, %v24_v7 }
   0x5   :  { %233 = vmatpush3.msra.mxu0 %v35_v8  ;;  %v37_v11 = vsel %vm29_vm3, %v25_v3, %v33_v6 }
   0x6   :  { %234 = vmatprep.subr.mxu0 %v248_v0  ;;  %240 = vmatpush3.msra.mxu1 %v37_v11  ;;  %v36_v13 = vsel %vm28_vm4, %v24_v7, %v32_v10 }
   0x7   :  { %235 = vmatpush3.msra.mxu0 %v34_v9  ;;  %241 = vmatprep.subr.mxu1 %v248_v0 }
   0x8   :  { %237 = vmatmul.mubr.msk.f32.vlgmr.msra.gmra.mxu0 %vm39_vm5, %v38_v12  ;;  %242 = vmatpush3.msra.mxu1 %v36_v13 }
   0x9   :  { %244 = vmatmul.mubr.msk.f32.vlgmr.msra.gmra.mxu1 %vm39_vm5, %v38_v12 }
  0xc8   :  { %v109_v14 = vpop.f32.mrf.mxu0 }
  0xc9   :  { %113 = vadd.xlane.f32.xlu0 %v109_v14  ;;  %v186_v15 = vpop.f32.mrf.mxu1  ;;  %v116_v16 = vmul.f32 %v109_v14, %v109_v14 }
  0xca   :  { %v238_v17 = vpop.f32.mrf.mxu0  ;;  %v193_v19 = vmul.f32 %v186_v15, %v186_v15 }
  0xcb   :  { %117 = vadd.xlane.f32.xlu1 %v116_v16  ;;  %v245_v18 = vpop.f32.mrf.mxu1 }
  0xcd   :  { %190 = vadd.xlane.f32.xlu0 %v186_v15 }
  0xcf   :  { %194 = vadd.xlane.f32.xlu1 %v193_v19 }
 0x152   :  { %v114_v20 = vpop.xlane.xlu0 %113 }
 0x154   :  { %v118_v21 = vpop.xlane.xlu1 %117 }
 0x156   :  { %v191_v22 = vpop.xlane.xlu0 %190 }
 0x157   :  { %v192_v23 = vadd.f32 %v191_v22, %v114_v20 }
 0x158   :  { %v195_v24 = vpop.xlane.xlu1 %194 }
 0x159   :  { %198 = vst.msk [vmem:[%s288_s2] sm:$0xff] %vm197_vm6, %v192_v23  ;;  %v196_v25 = vadd.f32 %v195_v24, %v118_v21 }
 0x15b   :  { %200 = vst.msk [vmem:[%s288_s2] sm:$0xff] %vm199_vm7, %v196_v25 }

</bundles_post_ra>
